<compile_context>
chip_gen: v6e
topology: v6e:2x2x1
jax: 0.10.0
libtpu: 0.0.40
codegen_flags: <defaults>
</compile_context>

<pallas_src>
import functools

import jax
import jax.numpy as jnp
from jax.experimental import pallas as pl
from jax.experimental.pallas import tpu as pltpu


_VMEM_BUDGET = 12 << 20    # bytes of VMEM the kernel's blocks may use
_VMEM_LIMIT = 14 << 20     # declared scoped-VMEM limit (<= v5e's 16 MiB default)
_MIN_INPUT_BYTES = 1 << 20  # below this, fall back to XLA's fused einsum
_BT_TARGET = 512           # switch to K-tiling rather than let bt drop below this


def _sublane(dtype) -> int:
    # sublane tile: 8 for 4-byte, 16 for 2-byte, 32 for 1-byte dtypes
    return max(8, 32 // jnp.dtype(dtype).itemsize)


def _round_up(x: int, m: int) -> int:
    return ((x + m - 1) // m) * m


# --------------------------------------------------------------------------- #
# Kernels
# --------------------------------------------------------------------------- #
def _single_k_kernel(x_ref, w_ref, o_ref):
    # x_ref: (bt, K)   lane-dense flattened vertices
    # w_ref: (K, N)    Kronecker-expanded regressor (same block every step)
    # o_ref: (bt, N)   flattened landmarks
    o_ref[...] = jnp.dot(
        x_ref[...], w_ref[...], preferred_element_type=jnp.float32
    ).astype(o_ref.dtype)


def _tiled_k_kernel(x_ref, w_ref, o_ref, acc_ref, *, k_valid, kt):
    # Grid: (grid_m, grid_k); K is the last ("arbitrary") reduction axis.
    k = pl.program_id(1)

    @pl.when(k == 0)
    def _init():
        acc_ref[...] = jnp.zeros_like(acc_ref)

    x = x_ref[...]
    if k_valid % kt != 0:
        # Final K block reads past the end of the (B, K) array; zero the
        # undefined pad columns (the cached weight's pad rows are already 0).
        col = jax.lax.broadcasted_iota(jnp.int32, x.shape, 1) + k * kt
        x = jnp.where(col < k_valid, x, jnp.zeros_like(x))

    acc_ref[...] += jnp.dot(x, w_ref[...], preferred_element_type=jnp.float32)

    @pl.when(k == pl.num_programs(1) - 1)
    def _finalize():
        o_ref[...] = acc_ref[...].astype(o_ref.dtype)


# --------------------------------------------------------------------------- #
# Tiling plan
# --------------------------------------------------------------------------- #
def _plan(B, K, N, dtype, vmem_budget, bt_target, force_k_tile=None):
    """Choose (tiled, kt, k_pad, grid_k, bt, grid_m) for the pallas_call."""
    it = jnp.dtype(dtype).itemsize
    sub = _sublane(dtype)

    # ---- K tiling decision -------------------------------------------------
    if force_k_tile is not None:
        kt = max(128, _round_up(min(force_k_tile, K), 128))
        tiled = True
    else:
        w_single = K * N * it                 # weight single-buffered (constant block)
        row_full = 2 * (K + N) * it           # double-buffered x + out per batch row
        avail = vmem_budget - w_single
        bt_cap_full = (avail // row_full) // sub * sub if avail > 0 else 0
        if bt_cap_full >= min(bt_target, B):
            kt, tiled = K, False
        else:
            # pick kt (multiple of 128) so ~bt_target rows fit alongside a
            # double-buffered (kt, N) weight block and an f32 accumulator
            num = vmem_budget - bt_target * N * (2 * it + 4)
            kt = num // (2 * it * (bt_target + N)) if num > 0 else 128
            kt = max(128, (kt // 128) * 128)
            kt = min(kt, _round_up(K, 128))
            tiled = kt < K
            if not tiled:
                kt = K

    grid_k = pl.cdiv(K, kt) if tiled else 1
    k_pad = grid_k * kt if tiled else K

    # ---- batch-row tile ------------------------------------------------------
    if tiled:
        w_buf = 2 * kt * N * it                       # weight block changes with k
        row_bytes = (2 * kt + 2 * N) * it + 4 * N     # x + out (2x) + f32 accumulator
    else:
        w_buf = K * N * it                            # Buffered(1): constant block
        row_bytes = 2 * (K + N) * it
    avail = max(vmem_budget - w_buf, sub * row_bytes)
    bt_cap = max(sub, (avail // row_bytes) // sub * sub)

    if B <= sub:
        bt = B                                        # single full-extent block
    else:
        # keep grid_m a multiple of 2 with near-equal halves so
        # dimension_semantics=("parallel", ...) balances v7x's two TensorCores
        pairs = pl.cdiv(B, 2 * bt_cap)
        bt = min(bt_cap, _round_up(pl.cdiv(B, 2 * pairs), sub))
    grid_m = pl.cdiv(B, bt)
    return tiled, kt, k_pad, grid_k, bt, grid_m


def _kron_weight(regressor, dtype, C, k_pad):
    """W[v*C + c, j*C + c'] = regressor[j, v] * (c == c'), zero-padded to k_pad rows."""
    J, V = regressor.shape
    K = V * C
    reg = regressor.astype(dtype)                    # mirror `.to(vertices.dtype)`
    eye_c = jnp.eye(C, dtype=dtype)
    w = (reg.T[:, None, :, None] * eye_c[None, :, None, :]).reshape(K, J * C)
    if k_pad != K:
        w = jnp.pad(w, ((0, k_pad - K), (0, 0)))
    return w


# --------------------------------------------------------------------------- #
# Module
# --------------------------------------------------------------------------- #
class LandmarksRegressorDense:
    """JAX/Pallas port of the PyTorch module's forward pass.

    The .npz loading / glob-based landmark selection of __init__ is host-side
    I/O; this port takes the stacked (J, V) regressor buffer directly.
    """

    def __init__(self, regressor, *, vmem_budget=_VMEM_BUDGET,
                 min_input_bytes_for_pallas=_MIN_INPUT_BYTES,
                 force_k_tile=None):
        self.regressor = jnp.asarray(regressor)
        self.vmem_budget = vmem_budget
        self.min_input_bytes = min_input_bytes_for_pallas
        self.force_k_tile = force_k_tile   # testing knob: force the K-tiled path
        self._w_cache = {}                 # (dtype, C, k_pad) -> expanded weight

    # weight is constant w.r.t. the batch: build once, reuse across calls
    def _weight(self, dtype, C, k_pad):
        key = (jnp.dtype(dtype), C, k_pad)
        if key not in self._w_cache:
            w = _kron_weight(self.regressor, dtype, C, k_pad)
            if not isinstance(w, getattr(jax.core, "Tracer", ())):
                self._w_cache[key] = w
            return w
        return self._w_cache[key]

    def __call__(self, vertices):
        if vertices.ndim == 2:
            # (V, C) -> (J, C): a few KB -- XLA einsum beats kernel setup.
            return jnp.einsum("vc,jv->jc", vertices,
                              self.regressor.astype(vertices.dtype))
        if vertices.ndim == 4:
            B, T, V, C = vertices.shape
            out = self._batched(vertices.reshape(B * T, V, C))
            return out.reshape(B, T, self.regressor.shape[0], C)
        return self._batched(vertices)

    def _batched(self, v_bvc):
        B, V, C = v_bvc.shape
        J, Vr = self.regressor.shape
        assert V == Vr, "vertex-count mismatch between vertices and regressor"

        dtype = v_bvc.dtype
        it = jnp.dtype(dtype).itemsize
        K = V * C
        N = J * C

        # Small input stream: fixed pallas_call / pipeline setup dominates,
        # so let XLA's fused einsum handle it.
        if B * K * it < self.min_input_bytes:
            return jnp.einsum("bvc,jv->bjc", v_bvc, self.regressor.astype(dtype))

        tiled, kt, k_pad, grid_k, bt, grid_m = _plan(
            B, K, N, dtype, self.vmem_budget, _BT_TARGET, self.force_k_tile)

        x_flat = v_bvc.reshape(B, K)         # zero-copy lane-dense view
        w = self._weight(dtype, C, k_pad)

        cost = pl.CostEstimate(
            flops=2 * B * k_pad * N,         # true MXU work of the Kronecker matmul
            transcendentals=0,
            bytes_accessed=it * (B * K + k_pad * N + B * N),
        )

        if not tiled:
            grid_spec = pltpu.PrefetchScalarGridSpec(
                num_scalar_prefetch=0,
                grid=(grid_m,),
                in_specs=[
                    # flattened vertices: bt rows per step, full lane-dense K.
                    # (only raise to Buffered(3) if profiling shows exposed DMA)
                    pl.BlockSpec((bt, K), lambda m: (m, 0)),
                    # constant weight block: single-buffer to free VMEM for bt
                    pl.BlockSpec((K, N), lambda m: (0, 0),
                                 pipeline_mode=pl.Buffered(1)),
                ],
                out_specs=pl.BlockSpec((bt, N), lambda m: (m, 0)),
            )
            kernel = _single_k_kernel
            dims = ("parallel",)
        else:
            grid_spec = pltpu.PrefetchScalarGridSpec(
                num_scalar_prefetch=0,
                grid=(grid_m, grid_k),
                in_specs=[
                    pl.BlockSpec((bt, kt), lambda m, k: (m, k)),
                    pl.BlockSpec((kt, N), lambda m, k: (k, 0)),
                ],
                out_specs=pl.BlockSpec((bt, N), lambda m, k: (m, 0)),
                scratch_shapes=[pltpu.VMEM((bt, N), jnp.float32)],
            )
            kernel = functools.partial(_tiled_k_kernel, k_valid=K, kt=kt)
            dims = ("parallel", "arbitrary")

        # TODO(synk): optionally zero-pad N (=J*C) to 128 lanes for unmasked
        # stores on v5e/v6e; skipped here since the wrapper-side slice adds an
        # extra HBM pass that likely outweighs the store-slot saving (measure).
        out_flat = pl.pallas_call(
            kernel,
            out_shape=jax.ShapeDtypeStruct((B, N), dtype),
            grid_spec=grid_spec,
            compiler_params=pltpu.CompilerParams(
                dimension_semantics=dims,
                vmem_limit_bytes=_VMEM_LIMIT,
            ),
            cost_estimate=cost,
        )(x_flat, w)

        return out_flat.reshape(B, J, C)


def landmarks_regressor_dense(vertices, regressor, **kwargs):
    """One-off functional wrapper; prefer the class so the Kronecker weight is cached."""
    return LandmarksRegressorDense(regressor, **kwargs)(vertices)


# --------------------------------------------------------------------------- #
# Demo / self-test
# --------------------------------------------------------------------------- #
if __name__ == "__main__":
    key = jax.random.PRNGKey(0)
    k_reg, k_v2, k_v3, k_v4 = jax.random.split(key, 4)

    # Deterministic synthetic regressor (stand-in for the stacked .npz data).
    J, V, C = 16, 256, 3
    regressor = jax.random.normal(k_reg, (J, V), dtype=jnp.float32)
    regressor = regressor / jnp.sum(jnp.abs(regressor), axis=-1, keepdims=True)

    # min_input_bytes_for_pallas=0 forces the Pallas path even though these
    # small demo problems sit below the default ~1 MiB XLA-fallback cutoff.
    module = LandmarksRegressorDense(regressor, min_input_bytes_for_pallas=0)

    B3 = 50                      # not a multiple of the batch tile -> partial final block
    B4, T4 = 2, 16
    v2 = jax.random.normal(k_v2, (V, C), dtype=jnp.float32)           # (V, C)
    v3 = jax.random.normal(k_v3, (B3, V, C), dtype=jnp.float32)       # (B, V, C)
    v4 = jax.random.normal(k_v4, (B4, T4, V, C), dtype=jnp.float32)   # (B, T, V, C)

    out2 = jax.block_until_ready(module(v2))
    out3 = jax.block_until_ready(module(v3))
    out4 = jax.block_until_ready(module(v4))

    # Exercise the K-reduction (tiled) path: forcing a 512-wide K tile on K=768
    # gives grid_k=2 with a partial final K block (accumulator + masking path).
    module_tiled = LandmarksRegressorDense(
        regressor, min_input_bytes_for_pallas=0, force_k_tile=512)
    out3_t = jax.block_until_ready(module_tiled(v3))

    # Cross-check against plain-JAX einsum references.
    ref2 = jnp.einsum("vc,jv->jc", v2, regressor)
    ref3 = jnp.einsum("bvc,jv->bjc", v3, regressor)
    ref4 = jnp.einsum("btvc,jv->btjc", v4, regressor)

    assert out2.shape == (J, C)
    assert out3.shape == (B3, J, C)
    assert out4.shape == (B4, T4, J, C)
    assert jnp.allclose(out2, ref2, atol=1e-5)
    assert jnp.allclose(out3, ref3, atol=1e-5)
    assert jnp.allclose(out4, ref4, atol=1e-5)
    assert jnp.allclose(out3_t, ref3, atol=1e-5)

    print("KERNEL_OK")
</pallas_src>

<mosaic_0001>
module attributes {stable_mosaic.version = 11 : i64} {
  func.func @_single_k_kernel(%arg0: i32, %arg1: memref<32x768xf32, #tpu.memory_space<vmem>>, %arg2: memref<768x48xf32, #tpu.memory_space<vmem>>, %arg3: memref<32x48xf32, #tpu.memory_space<vmem>>) attributes {dimension_semantics = [#tpu.dimension_semantics<parallel>], iteration_bounds = array<i64: 2>, scalar_prefetch = 0 : i64, scratch_operands = 0 : i64, tpu.core_type = #tpu.core_type<tc>, window_params = [{transform_indices = @transform_0, window_bounds = array<i64: 32, 768>}, {pipeline_mode = #tpu.pipeline_mode<synchronous>, transform_indices = @transform_1, window_bounds = array<i64: 768, 48>}, {transform_indices = @transform_2, window_bounds = array<i64: 32, 48>}]} {
    %c0 = arith.constant 0 : index
    %c0_0 = arith.constant 0 : index
    %0 = vector.load %arg1[%c0, %c0_0] : memref<32x768xf32, #tpu.memory_space<vmem>>, vector<32x768xf32>
    %c0_1 = arith.constant 0 : index
    %c0_2 = arith.constant 0 : index
    %1 = vector.load %arg2[%c0_1, %c0_2] : memref<768x48xf32, #tpu.memory_space<vmem>>, vector<768x48xf32>
    %cst = arith.constant dense<0.000000e+00> : vector<32x48xf32>
    %2 = tpu.matmul %0, %1, %cst {dimension_numbers = #tpu.dot_dimension_numbers<[1], [0], [0], [1], [0, 0, 1, 1], [], []>} : vector<32x768xf32>, vector<768x48xf32>, vector<32x48xf32> -> vector<32x48xf32>
    %c0_3 = arith.constant 0 : index
    %c0_4 = arith.constant 0 : index
    %3 = vector.load %arg3[%c0_3, %c0_4] : memref<32x48xf32, #tpu.memory_space<vmem>>, vector<32x48xf32>
    tpu.vector_store %arg3[%c0_3, %c0_4], %2 {strides = array<i32>} : memref<32x48xf32, #tpu.memory_space<vmem>>, vector<32x48xf32>,
    return
  }
  func.func @transform_0(%arg0: i32) -> (i32, i32) {
    %c0_i32 = arith.constant 0 : i32
    %c0_i32_0 = arith.constant 0 : i32
    return %arg0, %c0_i32 : i32, i32
  }
  func.func @transform_1(%arg0: i32) -> (i32, i32) {
    %c0_i32 = arith.constant 0 : i32
    %c0_i32_0 = arith.constant 0 : i32
    %c0_i32_1 = arith.constant 0 : i32
    return %c0_i32, %c0_i32_0 : i32, i32
  }
  func.func @transform_2(%arg0: i32) -> (i32, i32) {
    %c0_i32 = arith.constant 0 : i32
    %c0_i32_0 = arith.constant 0 : i32
    return %arg0, %c0_i32 : i32, i32
  }
}

</mosaic_0001>

<bundles_post_ra>
// kernel: tpu_custom_call.1
= control target key start
LH: loop header
LB: loop body
LE: loop exit
PB: predicated region body
PF: predicated region fallthrough
CT: control target
= control target key end

     0   :  { %s1164_s9 = smov 0   ;;  %s1166_s10 = smov 0   ;;  %s1587_s0 = inlined_call_operand.vmem [shape: f32[50,768], index: 0, kind: input, shape index: {}]   ;;  %s1588_s1 = inlined_call_operand.vmem [shape: f32[768,48], index: 1, kind: input, shape index: {}]   ;;  %s1589_s2 = inlined_call_operand.vmem [shape: f32[50,48], index: 2, kind: output, shape index: {}]  }
   0x1   :  { %s1168_s11 = smov 0  }
   0x2 LB: > { %s1177_s12 = sadd.s32 4294967295, %s1115_s11   ;;  %s1179_s13 = sadd.s32 1, %s1115_s11   ;;  %s1115_s11 = sphi %s1168_s11, %s1596_s11   ;;  %s1111_s10 = sphi %s1166_s10, %s1595_s10   ;;  %s1107_s9 = sphi %s1164_s9, %s1594_s9  }
   0x3   : > { %s63_s14 = ssub.s32 %s1115_s11, %s1179_s13  ;;  %s66_s15 = sadd.s32 1, %s1111_s10 }
   0x4   : > { %p64_p0 = scmp.eq.s32.totalorder %s63_s14, 0  ;;  %p76_p1 = scmp.ne.s32.totalorder %s1111_s10, %s1107_s9 }
   0x5   : > { %p77_p2 = scmp.eq.s32.totalorder %s1177_s12, 1  ;;  %p784_p3 = scmp.ge.s32.totalorder %s1115_s11, 1 }
   0x6   : > { %s1187_s16 = scalar_select %p64_p0, %s1111_s10, %s66_s15  }
   0x7   : > { %p1189_p4 = por %p77_p2, %p76_p1  ;;  %p124_p5 = scmp.lt.s32.totalorder %s1115_s11, 3 }
   0x9   : > { %p125_p6 = pnand %p784_p3, %p124_p5 }
   0xa   : > { %s1278_s30 = sshll.u32 (!%p125_p6), %s1177_s12, 2 }
   0xb   : > { %128 = sbr.rel (%p125_p6) target bundleno = 335 (0x14f), region = 28  ;;  %p157_p7 = scmp.lt.s32.totalorder (!%p125_p6), %s1278_s30, 6 }
  0x10   : > { %v228_v0 = vld [vmem:[%s1588_s1 + $0xf8] sm:$0xff]  ;;  %v227_v4 = vld [vmem:[%s1588_s1 + $0xf0] sm:$0xff]  ;;  %v226_v8 = vld [vmem:[%s1588_s1 + $0xe8] sm:$0xff]  ;;  %s1326_s14 = scalar_select %p157_p7, %s1278_s30, 6  ;;  %vm548_vm0 = vcmask 392192  }
  0x11   : > { %v260_v1 = vld [vmem:[%s1588_s1 + $0x1f8] sm:$0xff]  ;;  %808 = vmatprep.subr.mxu0 %v228_v0  ;;  %v259_v5 = vld [vmem:[%s1588_s1 + $0x1f0] sm:$0xff]  ;;  %v258_v9 = vld [vmem:[%s1588_s1 + $0x1e8] sm:$0xff]  ;;  %s561_s28 = ssub.s32 (%p1189_p4), 7, %s1278_s30  ;;  %s805_s29 = sshll.u32 (%p1189_p4), %s1177_s12, 5 }
  0x12   : > { %v212_v2 = vld [vmem:[%s1588_s1 + $0x78] sm:$0xff]  ;;  %852 = vmatprep.subr.mxu1 %v260_v1  ;;  %v211_v6 = vld [vmem:[%s1588_s1 + $0x70] sm:$0xff]  ;;  %v210_v10 = vld [vmem:[%s1588_s1 + $0x68] sm:$0xff]  ;;  %s972_s6 = smul.u32 48, %s1326_s14  ;;  %p562_p8 = scmp.lt.s32.totalorder (%p1189_p4), %s561_s28, 4 }
  0x13   : > { %v244_v3 = vld [vmem:[%s1588_s1 + $0x178] sm:$0xff]  ;;  %809 = vmatpush3.msra.mxu0 %v212_v2  ;;  %v243_v7 = vld [vmem:[%s1588_s1 + $0x170] sm:$0xff]  ;;  %v242_v11 = vld [vmem:[%s1588_s1 + $0x168] sm:$0xff]  ;;  %s1538_s7 = scalar_lea.vmem (%p1189_p4), %s1589_s2, %s805_s29  }
  0x14   : > { %853 = vmatpush3.msra.mxu1 %v244_v3  ;;  %810 = vmatprep.subr.mxu0 %v227_v4  ;;  %v225_v12 = vld [vmem:[%s1588_s1 + $0xe0] sm:$0xff]  ;;  %v224_v16 = vld [vmem:[%s1588_s1 + $0xd8] sm:$0xff]  ;;  %v223_v20 = vld [vmem:[%s1588_s1 + $0xd0] sm:$0xff]  ;;  %s1380_s4 = scalar_lea.vmem %s1587_s0, %s972_s6 }
  0x15   : > { %854 = vmatprep.subr.mxu1 %v259_v5  ;;  %811 = vmatpush3.msra.mxu0 %v211_v6  ;;  %v257_v13 = vld [vmem:[%s1588_s1 + $0x1e0] sm:$0xff]  ;;  %v256_v17 = vld [vmem:[%s1588_s1 + $0x1d8] sm:$0xff]  ;;  %v255_v21 = vld [vmem:[%s1588_s1 + $0x1d0] sm:$0xff] }
  0x16   : > { %855 = vmatpush3.msra.mxu1 %v243_v7  ;;  %812 = vmatprep.subr.mxu0 %v226_v8  ;;  %v209_v14 = vld [vmem:[%s1588_s1 + $0x60] sm:$0xff]  ;;  %v208_v18 = vld [vmem:[%s1588_s1 + $0x58] sm:$0xff]  ;;  %v207_v22 = vld [vmem:[%s1588_s1 + $0x50] sm:$0xff] }
  0x17   : > { %856 = vmatprep.subr.mxu1 %v258_v9  ;;  %v241_v15 = vld [vmem:[%s1588_s1 + $0x160] sm:$0xff]  ;;  %813 = vmatpush3.msra.mxu0 %v210_v10  ;;  %v240_v19 = vld [vmem:[%s1588_s1 + $0x158] sm:$0xff]  ;;  %v239_v23 = vld [vmem:[%s1588_s1 + $0x150] sm:$0xff] }
  0x18   : > { %857 = vmatpush3.msra.mxu1 %v242_v11  ;;  %814 = vmatprep.subr.mxu0 %v225_v12  ;;  %v222_v24 = vld [vmem:[%s1588_s1 + $0xc8] sm:$0xff]  ;;  %v221_v28 = vld [vmem:[%s1588_s1 + $0xc0] sm:$0xff]  ;;  %v220_v32 = vld [vmem:[%s1588_s1 + $0xb8] sm:$0xff] }
  0x19   : > { %858 = vmatprep.subr.mxu1 %v257_v13  ;;  %815 = vmatpush3.msra.mxu0 %v209_v14  ;;  %v254_v25 = vld [vmem:[%s1588_s1 + $0x1c8] sm:$0xff]  ;;  %v253_v29 = vld [vmem:[%s1588_s1 + $0x1c0] sm:$0xff]  ;;  %v252_v33 = vld [vmem:[%s1588_s1 + $0x1b8] sm:$0xff] }
  0x1a   : > { %859 = vmatpush3.msra.mxu1 %v241_v15  ;;  %816 = vmatprep.subr.mxu0 %v224_v16  ;;  %v206_v26 = vld [vmem:[%s1588_s1 + $0x48] sm:$0xff]  ;;  %v205_v30 = vld [vmem:[%s1588_s1 + $0x40] sm:$0xff]  ;;  %v204_v34 = vld [vmem:[%s1588_s1 + $0x38] sm:$0xff] }
  0x1b   : > { %860 = vmatprep.subr.mxu1 %v256_v17  ;;  %817 = vmatpush3.msra.mxu0 %v208_v18  ;;  %v238_v27 = vld [vmem:[%s1588_s1 + $0x148] sm:$0xff]  ;;  %v237_v31 = vld [vmem:[%s1588_s1 + $0x140] sm:$0xff]  ;;  %v236_v35 = vld [vmem:[%s1588_s1 + $0x138] sm:$0xff] }
  0x1c   : > { %861 = vmatpush3.msra.mxu1 %v240_v19  ;;  %818 = vmatprep.subr.mxu0 %v223_v20  ;;  %v219_v36 = vld [vmem:[%s1588_s1 + $0xb0] sm:$0xff]  ;;  %v218_v40 = vld [vmem:[%s1588_s1 + $0xa8] sm:$0xff]  ;;  %v217_v44 = vld [vmem:[%s1588_s1 + $0xa0] sm:$0xff] }
  0x1d   : > { %862 = vmatprep.subr.mxu1 %v255_v21  ;;  %819 = vmatpush3.msra.mxu0 %v207_v22  ;;  %v251_v37 = vld [vmem:[%s1588_s1 + $0x1b0] sm:$0xff]  ;;  %v250_v41 = vld [vmem:[%s1588_s1 + $0x1a8] sm:$0xff]  ;;  %v249_v45 = vld [vmem:[%s1588_s1 + $0x1a0] sm:$0xff] }
  0x1e   : > { %863 = vmatpush3.msra.mxu1 %v239_v23  ;;  %820 = vmatprep.subr.mxu0 %v222_v24  ;;  %v203_v38 = vld [vmem:[%s1588_s1 + $0x30] sm:$0xff]  ;;  %v202_v42 = vld [vmem:[%s1588_s1 + $0x28] sm:$0xff]  ;;  %v201_v46 = vld [vmem:[%s1588_s1 + $0x20] sm:$0xff] }
  0x1f   : > { %864 = vmatprep.subr.mxu1 %v254_v25  ;;  %821 = vmatpush3.msra.mxu0 %v206_v26  ;;  %v235_v39 = vld [vmem:[%s1588_s1 + $0x130] sm:$0xff]  ;;  %v234_v43 = vld [vmem:[%s1588_s1 + $0x128] sm:$0xff]  ;;  %v233_v47 = vld [vmem:[%s1588_s1 + $0x120] sm:$0xff] }
  0x20   : > { %865 = vmatpush3.msra.mxu1 %v238_v27  ;;  %822 = vmatprep.subr.mxu0 %v221_v28  ;;  %v216_v48 = vld [vmem:[%s1588_s1 + $0x98] sm:$0xff]  ;;  %v215_v52 = vld [vmem:[%s1588_s1 + $0x90] sm:$0xff]  ;;  %v214_v56 = vld [vmem:[%s1588_s1 + $0x88] sm:$0xff] }
  0x21   : > { %866 = vmatprep.subr.mxu1 %v253_v29  ;;  %823 = vmatpush3.msra.mxu0 %v205_v30  ;;  %v248_v49 = vld [vmem:[%s1588_s1 + $0x198] sm:$0xff]  ;;  %v247_v53 = vld [vmem:[%s1588_s1 + $0x190] sm:$0xff]  ;;  %v246_v57 = vld [vmem:[%s1588_s1 + $0x188] sm:$0xff] }
  0x22   : > { %867 = vmatpush3.msra.mxu1 %v237_v31  ;;  %824 = vmatprep.subr.mxu0 %v220_v32  ;;  %v200_v50 = vld [vmem:[%s1588_s1 + $0x18] sm:$0xff]  ;;  %v199_v54 = vld [vmem:[%s1588_s1 + $0x10] sm:$0xff]  ;;  %v198_v58 = vld [vmem:[%s1588_s1 + $0x8] sm:$0xff] }
  0x23   : > { %868 = vmatprep.subr.mxu1 %v252_v33  ;;  %825 = vmatpush3.msra.mxu0 %v204_v34  ;;  %v232_v51 = vld [vmem:[%s1588_s1 + $0x118] sm:$0xff]  ;;  %v231_v55 = vld [vmem:[%s1588_s1 + $0x110] sm:$0xff]  ;;  %v230_v59 = vld [vmem:[%s1588_s1 + $0x108] sm:$0xff] }
  0x24   : > { %869 = vmatpush3.msra.mxu1 %v236_v35  ;;  %826 = vmatprep.subr.mxu0 %v219_v36  ;;  %v213_v60 = vld [vmem:[%s1588_s1 + $0x80] sm:$0xff]  ;;  %v174_v63 = vld [vmem:[%s1380_s4 + $0x8] sm:$0xff]  ;;  %v176_v1 = vld [vmem:[%s1380_s4 + $0x18] sm:$0xff] }
  0x25   : > { %870 = vmatprep.subr.mxu1 %v251_v37  ;;  %827 = vmatpush3.msra.mxu0 %v203_v38  ;;  %v245_v61 = vld [vmem:[%s1588_s1 + $0x180] sm:$0xff]  ;;  %v175_v3 = vld [vmem:[%s1380_s4 + $0x10] sm:$0xff]  ;;  %v292_v4 = vld [vmem:[%s1588_s1 + $0x2f8] sm:$0xff] }
  0x26   : > { %871 = vmatpush3.msra.mxu1 %v235_v39  ;;  %828 = vmatprep.subr.mxu0 %v218_v40  ;;  %v197_v62 = vld [vmem:[%s1588_s1] sm:$0xff]  ;;  %v276_v5 = vld [vmem:[%s1588_s1 + $0x278] sm:$0xff]  ;;  %v291_v6 = vld [vmem:[%s1588_s1 + $0x2f0] sm:$0xff] }
  0x27   : > { %872 = vmatprep.subr.mxu1 %v250_v41  ;;  %829 = vmatpush3.msra.mxu0 %v202_v42  ;;  %v229_v0 = vld [vmem:[%s1588_s1 + $0x100] sm:$0xff]  ;;  %v275_v7 = vld [vmem:[%s1588_s1 + $0x270] sm:$0xff]  ;;  %v290_v8 = vld [vmem:[%s1588_s1 + $0x2e8] sm:$0xff] }
  0x28   : > { %873 = vmatpush3.msra.mxu1 %v234_v43  ;;  %830 = vmatprep.subr.mxu0 %v217_v44  ;;  %v173_v2 = vld [vmem:[%s1380_s4] sm:$0xff]  ;;  %v274_v9 = vld [vmem:[%s1588_s1 + $0x268] sm:$0xff]  ;;  %v288_v12 = vld [vmem:[%s1588_s1 + $0x2d8] sm:$0xff] }
  0x29   : > { %874 = vmatprep.subr.mxu1 %v249_v45  ;;  %831 = vmatpush3.msra.mxu0 %v201_v46  ;;  %v289_v10 = vld [vmem:[%s1588_s1 + $0x2e0] sm:$0xff]  ;;  %v272_v13 = vld [vmem:[%s1588_s1 + $0x258] sm:$0xff]  ;;  %v287_v14 = vld [vmem:[%s1588_s1 + $0x2d0] sm:$0xff] }
  0x2a   : > { %875 = vmatpush3.msra.mxu1 %v233_v47  ;;  %832 = vmatprep.subr.mxu0 %v216_v48  ;;  %v273_v11 = vld [vmem:[%s1588_s1 + $0x260] sm:$0xff]  ;;  %v271_v15 = vld [vmem:[%s1588_s1 + $0x250] sm:$0xff]  ;;  %v286_v16 = vld [vmem:[%s1588_s1 + $0x2c8] sm:$0xff] }
  0x2b   : > { %876 = vmatprep.subr.mxu1 %v248_v49  ;;  %833 = vmatpush3.msra.mxu0 %v200_v50  ;;  %v270_v17 = vld [vmem:[%s1588_s1 + $0x248] sm:$0xff]  ;;  %v285_v18 = vld [vmem:[%s1588_s1 + $0x2c0] sm:$0xff]  ;;  %v284_v20 = vld [vmem:[%s1588_s1 + $0x2b8] sm:$0xff] }
  0x2c   : > { %877 = vmatpush3.msra.mxu1 %v232_v51  ;;  %834 = vmatprep.subr.mxu0 %v215_v52  ;;  %v269_v19 = vld [vmem:[%s1588_s1 + $0x240] sm:$0xff]  ;;  %v180_v21 = vld [vmem:[%s1380_s4 + $0x38] sm:$0xff]  ;;  %v182_v22 = vld [vmem:[%s1380_s4 + $0x48] sm:$0xff] }
  0x2d   : > { %878 = vmatprep.subr.mxu1 %v247_v53  ;;  %835 = vmatpush3.msra.mxu0 %v199_v54  ;;  %v268_v23 = vld [vmem:[%s1588_s1 + $0x238] sm:$0xff]  ;;  %v179_v24 = vld [vmem:[%s1380_s4 + $0x30] sm:$0xff]  ;;  %v181_v25 = vld [vmem:[%s1380_s4 + $0x40] sm:$0xff] }
  0x2e   : > { %879 = vmatpush3.msra.mxu1 %v231_v55  ;;  %836 = vmatprep.subr.mxu0 %v214_v56  ;;  %v283_v26 = vld [vmem:[%s1588_s1 + $0x2b0] sm:$0xff]  ;;  %v282_v28 = vld [vmem:[%s1588_s1 + $0x2a8] sm:$0xff]  ;;  %v188_v30 = vld [vmem:[%s1380_s4 + $0x78] sm:$0xff] }
  0x2f   : > { %880 = vmatprep.subr.mxu1 %v246_v57  ;;  %837 = vmatpush3.msra.mxu0 %v198_v58  ;;  %v267_v27 = vld [vmem:[%s1588_s1 + $0x230] sm:$0xff]  ;;  %v186_v29 = vld [vmem:[%s1380_s4 + $0x68] sm:$0xff]  ;;  %v185_v32 = vld [vmem:[%s1380_s4 + $0x60] sm:$0xff] }
  0x30   : > { %881 = vmatpush3.msra.mxu1 %v230_v59  ;;  %838 = vmatprep.subr.mxu0 %v213_v60  ;;  %v266_v31 = vld [vmem:[%s1588_s1 + $0x228] sm:$0xff]  ;;  %v187_v33 = vld [vmem:[%s1380_s4 + $0x70] sm:$0xff]  ;;  %v281_v34 = vld [vmem:[%s1588_s1 + $0x2a0] sm:$0xff] }
  0x31   : > { %882 = vmatprep.subr.mxu1 %v245_v61  ;;  %839 = vmatpush3.msra.mxu0 %v197_v62  ;;  %v265_v35 = vld [vmem:[%s1588_s1 + $0x220] sm:$0xff]  ;;  %v280_v36 = vld [vmem:[%s1588_s1 + $0x298] sm:$0xff]  ;;  %v194_v38 = vld [vmem:[%s1380_s4 + $0xa8] sm:$0xff] }
  0x32   : > { %357 = vmatprep.mubr.f32.mxu0 %v174_v63  ;;  %883 = vmatpush3.msra.mxu1 %v229_v0  ;;  %v192_v37 = vld [vmem:[%s1380_s4 + $0x98] sm:$0xff]  ;;  %v191_v40 = vld [vmem:[%s1380_s4 + $0x90] sm:$0xff]  ;;  %v193_v41 = vld [vmem:[%s1380_s4 + $0xa0] sm:$0xff] }
  0x33   : > { %442 = vmatprep.mubr.f32.mxu1 %v176_v1  ;;  %358 = vmatmul.mubr.f32.vlgmr.msra.gmra.mxu0 %v173_v2  ;;  %v264_v39 = vld [vmem:[%s1588_s1 + $0x218] sm:$0xff]  ;;  %v279_v42 = vld [vmem:[%s1588_s1 + $0x290] sm:$0xff]  ;;  %v278_v44 = vld [vmem:[%s1588_s1 + $0x288] sm:$0xff] }
  0x34   : > { %443 = vmatmul.mubr.f32.vlgmr.msra.gmra.mxu1 %v175_v3  ;;  %896 = vmatprep.subr.mxu0 %v292_v4  ;;  %v263_v43 = vld [vmem:[%s1588_s1 + $0x210] sm:$0xff]  ;;  %v262_v45 = vld [vmem:[%s1588_s1 + $0x208] sm:$0xff]  ;;  %v277_v46 = vld [vmem:[%s1588_s1 + $0x280] sm:$0xff] }
  0x35   : > { %940 = vmatprep.subr.mxu1 %v292_v4  ;;  %897 = vmatpush3.msra.mxu0 %v276_v5  ;;  %v261_v47 = vld [vmem:[%s1588_s1 + $0x200] sm:$0xff]  ;;  %v178_v48 = vld [vmem:[%s1380_s4 + $0x28] sm:$0xff]  ;;  %v184_v52 = vld [vmem:[%s1380_s4 + $0x58] sm:$0xff] }
  0x36   : > { %956 = vmatpush3.msra.mxu1 %v276_v5  ;;  %898 = vmatprep.subr.mxu0 %v291_v6  ;;  %v190_v49 = vld [vmem:[%s1380_s4 + $0x88] sm:$0xff]  ;;  %v177_v50 = vld [vmem:[%s1380_s4 + $0x20] sm:$0xff]  ;;  %v196_v53 = vld [vmem:[%s1380_s4 + $0xb8] sm:$0xff] }
  0x37   : > { %941 = vmatprep.subr.mxu1 %v291_v6  ;;  %899 = vmatpush3.msra.mxu0 %v275_v7  ;;  %v189_v51 = vld [vmem:[%s1380_s4 + $0x80] sm:$0xff]  ;;  %v183_v54 = vld [vmem:[%s1380_s4 + $0x50] sm:$0xff] }
  0x38   : > { %957 = vmatpush3.msra.mxu1 %v275_v7  ;;  %900 = vmatprep.subr.mxu0 %v290_v8  ;;  %v195_v55 = vld [vmem:[%s1380_s4 + $0xb0] sm:$0xff]  ;;  %s148_s4 = sand.u32 1, %s1107_s9  }
  0x39   : > { %942 = vmatprep.subr.mxu1 %v290_v8  ;;  %901 = vmatpush3.msra.mxu0 %v274_v9  ;;  %s785_s27 = sshll.u32 %s148_s4, 5 }
  0x3a   : > { %958 = vmatpush3.msra.mxu1 %v274_v9  ;;  %902 = vmatprep.subr.mxu0 %v289_v10  ;;  %s1521_s9 = scalar_lea.vmem [#allocation2], %s785_s27  }
  0x3b   : > { %943 = vmatprep.subr.mxu1 %v289_v10  ;;  %903 = vmatpush3.msra.mxu0 %v273_v11 }
  0x3c   : > { %959 = vmatpush3.msra.mxu1 %v273_v11  ;;  %904 = vmatprep.subr.mxu0 %v288_v12 }
  0x3d   : > { %944 = vmatprep.subr.mxu1 %v288_v12  ;;  %905 = vmatpush3.msra.mxu0 %v272_v13 }
  0x3e   : > { %960 = vmatpush3.msra.mxu1 %v272_v13  ;;  %906 = vmatprep.subr.mxu0 %v287_v14 }
  0x3f   : > { %945 = vmatprep.subr.mxu1 %v287_v14  ;;  %907 = vmatpush3.msra.mxu0 %v271_v15 }
  0x40   : > { %961 = vmatpush3.msra.mxu1 %v271_v15  ;;  %908 = vmatprep.subr.mxu0 %v286_v16 }
  0x41   : > { %946 = vmatprep.subr.mxu1 %v286_v16  ;;  %909 = vmatpush3.msra.mxu0 %v270_v17 }
  0x42   : > { %962 = vmatpush3.msra.mxu1 %v270_v17  ;;  %910 = vmatprep.subr.mxu0 %v285_v18 }
  0x43   : > { %947 = vmatprep.subr.mxu1 %v285_v18  ;;  %911 = vmatpush3.msra.mxu0 %v269_v19 }
  0x44   : > { %963 = vmatpush3.msra.mxu1 %v269_v19  ;;  %912 = vmatprep.subr.mxu0 %v284_v20 }
  0x45   : > { %948 = vmatprep.subr.mxu1 %v284_v20  ;;  %362 = vmatprep.mubr.f32.mxu0 %v180_v21 }
  0x46   : > { %447 = vmatprep.mubr.f32.mxu1 %v182_v22  ;;  %913 = vmatpush3.msra.mxu0 %v268_v23 }
  0x47   : > { %964 = vmatpush3.msra.mxu1 %v268_v23  ;;  %363 = vmatmul.mubr.f32.gmra.mxu0 %v179_v24 }
  0x48   : > { %448 = vmatmul.mubr.f32.gmra.mxu1 %v181_v25  ;;  %914 = vmatprep.subr.mxu0 %v283_v26 }
  0x49   : > { %949 = vmatprep.subr.mxu1 %v283_v26  ;;  %915 = vmatpush3.msra.mxu0 %v267_v27 }
  0x4a   : > { %965 = vmatpush3.msra.mxu1 %v267_v27  ;;  %916 = vmatprep.subr.mxu0 %v282_v28 }
  0x4b   : > { %950 = vmatprep.subr.mxu1 %v282_v28  ;;  %367 = vmatprep.mubr.f32.mxu0 %v186_v29 }
  0x4c   : > { %452 = vmatprep.mubr.f32.mxu1 %v188_v30  ;;  %917 = vmatpush3.msra.mxu0 %v266_v31 }
  0x4d   : > { %966 = vmatpush3.msra.mxu1 %v266_v31  ;;  %368 = vmatmul.mubr.f32.gmra.mxu0 %v185_v32 }
  0x4e   : > { %453 = vmatmul.mubr.f32.gmra.mxu1 %v187_v33  ;;  %918 = vmatprep.subr.mxu0 %v281_v34 }
  0x4f   : > { %951 = vmatprep.subr.mxu1 %v281_v34  ;;  %919 = vmatpush3.msra.mxu0 %v265_v35 }
  0x50   : > { %967 = vmatpush3.msra.mxu1 %v265_v35  ;;  %920 = vmatprep.subr.mxu0 %v280_v36 }
  0x51   : > { %952 = vmatprep.subr.mxu1 %v280_v36  ;;  %372 = vmatprep.mubr.f32.mxu0 %v192_v37 }
  0x52   : > { %457 = vmatprep.mubr.f32.mxu1 %v194_v38  ;;  %921 = vmatpush3.msra.mxu0 %v264_v39 }
  0x53   : > { %968 = vmatpush3.msra.mxu1 %v264_v39  ;;  %373 = vmatmul.mubr.f32.gmra.mxu0 %v191_v40 }
  0x54   : > { %458 = vmatmul.mubr.f32.gmra.mxu1 %v193_v41  ;;  %922 = vmatprep.subr.mxu0 %v279_v42 }
  0x55   : > { %953 = vmatprep.subr.mxu1 %v279_v42  ;;  %923 = vmatpush3.msra.mxu0 %v263_v43 }
  0x56   : > { %969 = vmatpush3.msra.mxu1 %v263_v43  ;;  %924 = vmatprep.subr.mxu0 %v278_v44 }
  0x57   : > { %954 = vmatprep.subr.mxu1 %v278_v44  ;;  %925 = vmatpush3.msra.mxu0 %v262_v45 }
  0x58   : > { %970 = vmatpush3.msra.mxu1 %v262_v45  ;;  %926 = vmatprep.subr.mxu0 %v277_v46 }
  0x59   : > { %955 = vmatprep.subr.mxu1 %v277_v46  ;;  %927 = vmatpush3.msra.mxu0 %v261_v47 }
  0x5a   : > { %971 = vmatpush3.msra.mxu1 %v261_v47  ;;  %527 = vmatprep.mubr.f32.mxu0 %v178_v48 }
  0x5b   : > { %537 = vmatprep.mubr.f32.mxu1 %v190_v49  ;;  %528 = vmatmul.mubr.f32.vlgmr.msra.gmra.mxu0 %v177_v50 }
  0x5c   : > { %538 = vmatmul.mubr.f32.vlgmr.msra.gmra.mxu1 %v189_v51  ;;  %532 = vmatprep.mubr.f32.mxu0 %v184_v52 }
  0x5d   : > { %542 = vmatprep.mubr.f32.mxu1 %v196_v53 }
  0x5f   : > { %533 = vmatmul.mubr.f32.gmra.mxu0 %v183_v54 }
  0x60   : > { %543 = vmatmul.mubr.f32.gmra.mxu1 %v195_v55 }
  0xf3   : > { %v840_v56 = vpop.f32.mrf.mxu0 }
  0xf4   : > { %v884_v57 = vpop.f32.mrf.mxu1 }
  0xf5   : > { %v841_v58 = vpop.f32.mrf.mxu0 }
  0xf6   : > { %v885_v59 = vpop.f32.mrf.mxu1  ;;  %v842_v6 = vadd.f32 %v841_v58, %v840_v56 }
  0xf7   : > { %v886_v7 = vadd.f32 %v885_v59, %v884_v57 }
  0xf9   : > { %v445_v14 = vadd.f32 %v886_v7, %v842_v6 }
 0x107   : > { %v843_v60 = vpop.f32.mrf.mxu0 }
 0x108   : > { %v887_v61 = vpop.f32.mrf.mxu1 }
 0x109   : > { %v844_v62 = vpop.f32.mrf.mxu0 }
 0x10a   : > { %v888_v63 = vpop.f32.mrf.mxu1  ;;  %v845_v15 = vadd.f32 %v844_v62, %v843_v60 }
 0x10b   : > { %v889_v16 = vadd.f32 %v888_v63, %v887_v61 }
 0x10d   : > { %v846_v0 = vpop.f32.mrf.mxu0  ;;  %v450_v30 = vadd.f32 %v889_v16, %v845_v15 }
 0x10e   : > { %v890_v1 = vpop.f32.mrf.mxu1 }
 0x10f   : > { %v847_v2 = vpop.f32.mrf.mxu0 }
 0x110   : > { %v891_v3 = vpop.f32.mrf.mxu1  ;;  %v848_v8 = vadd.f32 %v847_v2, %v846_v0 }
 0x111   : > { %v892_v9 = vadd.f32 %v891_v3, %v890_v1 }
 0x113   : > { %v849_v4 = vpop.f32.mrf.mxu0  ;;  %v455_v17 = vadd.f32 %v892_v9, %v848_v8 }
 0x114   : > { %v893_v5 = vpop.f32.mrf.mxu1 }
 0x115   : > { %v850_v10 = vpop.f32.mrf.mxu0 }
 0x116   : > { %v894_v11 = vpop.f32.mrf.mxu1  ;;  %v851_v20 = vadd.f32 %v850_v10, %v849_v4 }
 0x117   : > { %v895_v21 = vadd.f32 %v894_v11, %v893_v5 }
 0x119   : > { %v460_v31 = vadd.f32 %v895_v21, %v851_v20 }
 0x11b   : > { %v928_v12 = vpop.f32.mrf.mxu0 }
 0x11c   : > { %v934_v13 = vpop.f32.mrf.mxu1 }
 0x11d   : > { %v929_v18 = vpop.f32.mrf.mxu0 }
 0x11e   : > { %v935_v19 = vpop.f32.mrf.mxu1  ;;  %v930_v22 = vadd.f32 %v929_v18, %v928_v12 }
 0x11f   : > { %v936_v23 = vadd.f32 %v935_v19, %v934_v13  ;;  %v931_v24 = vpop.f32.mrf.mxu0 }
 0x120   : > { %v937_v25 = vpop.f32.mrf.mxu1  ;;  %v530_v26 = vadd.f32 %v930_v22, %v445_v14 }
 0x121   : > { %v540_v27 = vadd.f32 %v936_v23, %v455_v17  ;;  %v932_v28 = vpop.f32.mrf.mxu0 }
 0x122   : > { %v938_v29 = vpop.f32.mrf.mxu1  ;;  %549 = vst.msk [vmem:[%s1521_s9] sm:$0xff] %vm548_vm0, %v530_v26  ;;  %v933_v32 = vadd.f32 %v932_v28, %v931_v24 }
 0x123   : > { %551 = vst.msk [vmem:[%s1521_s9 + $0x10] sm:$0xff] %vm548_vm0, %v540_v27  ;;  %v939_v33 = vadd.f32 %v938_v29, %v937_v25  ;;  %559 = sbr.rel (!%p1189_p4) target bundleno = 335 (0x14f), region = 32 }
 0x124   : > { %v535_v34 = vadd.f32 %v933_v32, %v450_v30 }
 0x125   : > { %v545_v35 = vadd.f32 %v939_v33, %v460_v31 }
 0x126   : > { %550 = vst.msk [vmem:[%s1521_s9 + $0x8] sm:$0xff] %vm548_vm0, %v535_v34 }
 0x127   : > { %552 = vst.msk [vmem:[%s1521_s9 + $0x18] sm:$0xff] %vm548_vm0, %v545_v35 }
 0x128   : > { %s1598_s28 = smov (!%p562_p8, %s561_s28), 4 }
 0x129   : > { %s790_s8 = sshll.u32 %s1598_s28, 7 }
 0x12a   : > { %p793_p9 = scmp.eq.s32.totalorder %s790_s8, 0 }
 0x12b   : > { %s1544_s11 = sshrl.u32 (!%p793_p9), %s1598_s28, 2 }
 0x12c   : > { %570 = sbr.rel (%p793_p9) target bundleno = 335 (0x14f), region = 36  ;;  %p794_p10 = scmp.le.s32.totalorder (!%p793_p9), %s1544_s11, 0 }
 0x131   : > { %737 = sbr.rel (%p794_p10) target bundleno = 318 (0x13e), region = 112  ;;  %s1591_s12 = smov (!%p794_p10), %s1538_s7 }
 0x132   : > { %s1592_s17 = smov (!%p794_p10), %s1521_s9  ;;  %s1553_s30 = smov (!%p794_p10), 0  }
 0x133   : > { %s1129_s15 = smov (!%p794_p10), 0  }
 0x136 LB: >> { %v639_v36 = vld [vmem:[%s1123_s17] sm:$0xff]  ;;  %v641_v37 = vld [vmem:[%s1123_s17 + $0x8] sm:$0xff]  ;;  %v643_v38 = vld [vmem:[%s1123_s17 + $0x10] sm:$0xff]  ;;  %s647_s18 = sadd.s32 1, %s1127_s30  ;;  %s633_s15 = sadd.s32 1, %s1131_s15   ;;  %s1131_s15 = sphi %s1129_s15, %s633_s15   ;;  %s1127_s30 = sphi %s1553_s30, %s1593_s30   ;;  %s1123_s17 = sphi %s1592_s17, %s652_s17   ;;  %s1119_s12 = sphi %s1591_s12, %s653_s12  }
 0x137   : >> { %640 = vst [vmem:[%s1119_s12] sm:$0xff] %v639_v36  ;;  %642 = vst [vmem:[%s1119_s12 + $0x8] sm:$0xff] %v641_v37  ;;  %v645_v39 = vld [vmem:[%s1123_s17 + $0x18] sm:$0xff]  ;;  %p648_p11 = scmp.ge.s32.totalorder %s647_s18, %s1544_s11  ;;  %p632_p12 = scmp.ge.s32.totalorder %s633_s15, %s1544_s11 }
 0x138   : >> { %644 = vst [vmem:[%s1119_s12 + $0x10] sm:$0xff] %v643_v38  ;;  %646 = vst [vmem:[%s1119_s12 + $0x18] sm:$0xff] %v645_v39 }
 0x139   : >> { %s1600_s18 = smov (%p648_p11, %s647_s18), 0  ;;  %635 = sbr.rel (!%p632_p12) target bundleno = 310 (0x136), region = 118 }
 0x13a   : >> { %s795_s6 = sshll.u32 %s1600_s18, 5  ;;  %s1593_s30 = smov %s1600_s18 }
 0x13b   : >> { %s652_s17 = scalar_lea.vmem %s1521_s9, %s795_s6 [#allocation2]   ;;  %s653_s12 = scalar_lea.vmem %s1538_s7, %s795_s6  }
 0x13e PF: > { %s1569_s19 = sand.u32 3, %s1598_s28   ;;  %s806_s20 = sshll.u32 %s1544_s11, 5 }
 0x13f   : > { %s658_s21 = scalar_lea.vmem %s1521_s9, %s806_s20 [#allocation2]   ;;  %s660_s14 = scalar_lea.vmem %s1538_s7, %s806_s20  }
 0x140   : > { %p800_p13 = scmp.le.s32.totalorder %s1569_s19, 0 }
 0x141   : > { %s1133_s22 = smov (!%p800_p13), %s660_s14   ;;  %s1137_s23 = smov (!%p800_p13), %s658_s21  }
 0x142   : > { %751 = sbr.rel (%p800_p13) target bundleno = 335 (0x14f), region = 123  ;;  %s1141_s24 = smov (!%p800_p13), 0  }
 0x143   : > { %s1145_s25 = smov (!%p800_p13), 0  }
 0x147 LB: >> { %v670_v40 = vld [vmem:[%s1139_s23] sm:$0xff]  ;;  %s672_s26 = sadd.s32 1, %s1143_s24  ;;  %s664_s25 = sadd.s32 1, %s1147_s25   ;;  %s1147_s25 = sphi %s1145_s25, %s664_s25   ;;  %s1143_s24 = sphi %s1141_s24, %s1142_s24   ;;  %s1139_s23 = sphi %s1137_s23, %s677_s23   ;;  %s1135_s22 = sphi %s1133_s22, %s678_s22  }
 0x148   : >> { %671 = vst [vmem:[%s1135_s22] sm:$0xff] %v670_v40  ;;  %p673_p0 = scmp.ge.s32.totalorder %s672_s26, %s1569_s19  ;;  %p663_p1 = scmp.ge.s32.totalorder %s664_s25, %s1569_s19 }
 0x14a   : >> { %s1602_s26 = smov (%p673_p0, %s672_s26), 0  ;;  %666 = sbr.rel (!%p663_p1) target bundleno = 327 (0x147), region = 129 }
 0x14b   : >> { %s801_s4 = sshll.u32 %s1602_s26, 3  ;;  %s1142_s24 = smov %s1602_s26  }
 0x14c   : >> { %s677_s23 = scalar_lea.vmem %s658_s21, %s801_s4 [#allocation2]   ;;  %s678_s22 = scalar_lea.vmem %s660_s14, %s801_s4  }
 0x14f PF: > { %p9_p2 = scmp.ge.s32.totalorder %s1179_s13, 4   ;;  %s1594_s9 = smov %s1111_s10 }
 0x150   : > { %s1595_s10 = smov %s1187_s16  ;;  %s1596_s11 = smov %s1179_s13 }
 0x151   :  { %11 = sbr.rel (!%p9_p2) target bundleno = 2 (0x2), region = 140 }

</bundles_post_ra>
